<compile_context>
chip_gen: v7x
topology: tpu7x:2x2x1
jax: 0.10.0
libtpu: 0.0.40
codegen_flags: <defaults>
</compile_context>

<pallas_src>
import functools

import jax
import jax.numpy as jnp
from jax.experimental import pallas as pl
from jax.experimental.pallas import tpu as pltpu


def _linear_kernel(x_ref, w_ref, b_ref, o_ref, *, tn, single_k):
    # x_ref: [tm, tk]   w_ref: [tk, tn]   b_ref: [1, gn*tn] (resident)
    # o_ref: [tm, tn] f32, resident across the K grid axis (accumulator).
    j = pl.program_id(1)
    off = pl.multiple_of(j * tn, tn)

    part = jnp.dot(x_ref[...], w_ref[...], preferred_element_type=jnp.float32)
    bias = b_ref[:, pl.ds(off, tn)]  # [1, tn], broadcast over sublanes

    if single_k:
        # Whole reduction in one step: single fused store.
        o_ref[...] = (part + bias).astype(o_ref.dtype)
    else:
        k = pl.program_id(2)

        @pl.when(k == 0)
        def _():
            o_ref[...] = part.astype(o_ref.dtype)

        @pl.when(k != 0)
        def _():
            o_ref[...] += part.astype(o_ref.dtype)

        @pl.when(k == pl.num_programs(2) - 1)
        def _():
            # Bias added exactly once, in the finalize step.
            o_ref[...] += bias.astype(o_ref.dtype)


def _choose_tiles(M, K, N, operand_bytes):
    """Pick lane/MXU-friendly tiles that fit a conservative VMEM budget."""
    budget = 24 * 1024 * 1024  # headroom under the 32 MiB scoped VMEM limit

    # Prefer 512-wide tiles (multiple of 256 -> fills the v6e/v7x MXU); shrink
    # to the full dim for small layers (full-dim blocks are always legal).
    tm = 512 if M > 512 else M
    tn = 512 if N > 512 else N

    # Keep >= 2 blocks along a parallel axis so both v7x TensorCores get work.
    if pl.cdiv(M, tm) * pl.cdiv(N, tn) == 1:
        if tm % 16 == 0:
            tm //= 2          # prefer splitting M: keeps tn MXU-256-wide
        elif tn % 256 == 0:
            tn //= 2

    def fits(tk):
        # double-buffered operand tiles + revisited f32 output tile (+ its
        # writeback buffer) + resident bias row
        return (2 * tk * (tm + tn) * operand_bytes
                + 2 * tm * tn * 4
                + pl.cdiv(N, tn) * tn * 4) <= budget

    if fits(K):
        tk = K                # collapse the reduction: one K step
    else:
        tk = 128
        while tk * 2 < K and fits(tk * 2):
            tk *= 2
    return tm, tn, tk


@functools.partial(jax.jit, static_argnames=("operand_dtype",))
def linear_forward(x, w, b, *, operand_dtype=jnp.bfloat16):
    """Pallas forward for a dense layer: y = x @ w + b (f32 output).

    x: [B, IN]  w: [IN, OUT]  b: [OUT]
    MXU operands are fed in `operand_dtype` (bf16 by default -> half the HBM
    traffic); accumulation is always f32.  Pass operand_dtype=jnp.float32 for
    exact f32 nn.Linear numerics.
    """
    M, K = x.shape
    K2, N = w.shape
    assert K == K2 and b.shape == (N,)

    op_bytes = jnp.dtype(operand_dtype).itemsize
    tm, tn, tk = _choose_tiles(M, K, N, op_bytes)

    # Cast once in HBM (not per tile inside the kernel).
    xo = x.astype(operand_dtype)
    wo = w.astype(operand_dtype)

    # Only K ever needs zero padding (exact for the dot); ragged M/N edges are
    # handled by the cdiv grid (out-of-bounds output writes are discarded).
    k_pad = (-K) % tk
    if k_pad:
        xo = jnp.pad(xo, ((0, 0), (0, k_pad)))
        wo = jnp.pad(wo, ((0, k_pad), (0, 0)))
    Kp = K + k_pad

    gm, gn, gk = pl.cdiv(M, tm), pl.cdiv(N, tn), Kp // tk

    # Bias: one resident VMEM row covering all column tiles (padded to gn*tn so
    # the in-kernel dynamic slice never goes out of bounds).
    Nb = gn * tn
    bp = jnp.zeros((1, Nb), jnp.float32).at[0, :N].set(b.astype(jnp.float32))

    kernel = functools.partial(_linear_kernel, tn=tn, single_k=(gk == 1))

    return pl.pallas_call(
        kernel,
        out_shape=jax.ShapeDtypeStruct((M, N), jnp.float32),
        grid_spec=pltpu.PrefetchScalarGridSpec(
            num_scalar_prefetch=0,
            grid=(gm, gn, gk),
            in_specs=[
                pl.BlockSpec((tm, tk), lambda i, j, k: (i, k)),
                pl.BlockSpec((tk, tn), lambda i, j, k: (k, j)),
                pl.BlockSpec((1, Nb), lambda i, j, k: (0, 0)),
            ],
            out_specs=pl.BlockSpec((tm, tn), lambda i, j, k: (i, j)),
        ),
        compiler_params=pltpu.CompilerParams(
            dimension_semantics=("parallel", "parallel", "arbitrary"),
            vmem_limit_bytes=32 * 1024 * 1024,
        ),
    )(xo, wo, bp)


if __name__ == "__main__":
    # Small dense-layer shapes consistent with a concrete BaseModel forward.
    # Tile heuristic picks tm=128, tn=256, tk=K=512 -> grid (2, 1, 1): both M
    # tiles can be sharded across TCs and the reduction is a single step.
    batch, in_features, out_features = 256, 512, 256

    key = jax.random.PRNGKey(0)
    kx, kw, kb = jax.random.split(key, 3)

    # Deterministic synthetic "parameters" (no checkpoint load).
    x = jax.random.normal(kx, (batch, in_features), dtype=jnp.float32)
    w = jax.random.normal(kw, (in_features, out_features), dtype=jnp.float32) * 0.1
    b = jax.random.normal(kb, (out_features,), dtype=jnp.float32) * 0.1

    y = linear_forward(x, w, b)
    jax.block_until_ready(y)

    # Reference with the same bf16-operand / f32-accumulate numerics.
    y_ref = jnp.dot(
        x.astype(jnp.bfloat16),
        w.astype(jnp.bfloat16),
        preferred_element_type=jnp.float32,
    ) + b
    assert y.shape == (batch, out_features)
    assert jnp.allclose(y, y_ref, atol=1e-3, rtol=1e-3), float(
        jnp.max(jnp.abs(y - y_ref))
    )
    # Sanity vs. full-f32 reference (loose: bf16 operand rounding).
    assert jnp.allclose(y, x @ w + b, atol=5e-2, rtol=5e-2)

    print("KERNEL_OK")
</pallas_src>

<mosaic_0001>
module attributes {stable_mosaic.version = 11 : i64} {
  func.func @_linear_kernel(%arg0: i32, %arg1: i32, %arg2: i32, %arg3: memref<128x512xbf16, #tpu.memory_space<vmem>>, %arg4: memref<512x256xbf16, #tpu.memory_space<vmem>>, %arg5: memref<1x256xf32, #tpu.memory_space<vmem>>, %arg6: memref<128x256xf32, #tpu.memory_space<vmem>>) attributes {dimension_semantics = [#tpu.dimension_semantics<parallel>, #tpu.dimension_semantics<parallel>, #tpu.dimension_semantics<arbitrary>], iteration_bounds = array<i64: 2, 1, 1>, scalar_prefetch = 0 : i64, scratch_operands = 0 : i64, tpu.core_type = #tpu.core_type<tc>, window_params = [{transform_indices = @transform_0, window_bounds = array<i64: 128, 512>}, {transform_indices = @transform_1, window_bounds = array<i64: 512, 256>}, {pipeline_mode = #tpu.pipeline_mode<synchronous>, transform_indices = @transform_2, window_bounds = array<i64: 1, 256>}, {transform_indices = @transform_3, window_bounds = array<i64: 128, 256>}]} {
    %c256_i32 = arith.constant 256 : i32
    %0 = arith.muli %arg1, %c256_i32 : i32
    %1 = tpu.assume_multiple %0, 256 : i32
    %c0 = arith.constant 0 : index
    %c0_0 = arith.constant 0 : index
    %2 = vector.load %arg3[%c0, %c0_0] : memref<128x512xbf16, #tpu.memory_space<vmem>>, vector<128x512xbf16>
    %c0_1 = arith.constant 0 : index
    %c0_2 = arith.constant 0 : index
    %3 = vector.load %arg4[%c0_1, %c0_2] : memref<512x256xbf16, #tpu.memory_space<vmem>>, vector<512x256xbf16>
    %cst = arith.constant dense<0.000000e+00> : vector<128x256xf32>
    %4 = tpu.matmul %2, %3, %cst {dimension_numbers = #tpu.dot_dimension_numbers<[1], [0], [0], [1], [0, 0, 1, 1], [], []>} : vector<128x512xbf16>, vector<512x256xbf16>, vector<128x256xf32> -> vector<128x256xf32>
    %c0_3 = arith.constant 0 : index
    %5 = arith.index_cast %1 : i32 to index
    %6 = vector.load %arg5[%c0_3, %5] : memref<1x256xf32, #tpu.memory_space<vmem>>, vector<1x256xf32>
    %7 = vector.broadcast %6 : vector<1x256xf32> to vector<128x256xf32>
    %8 = arith.addf %4, %7 : vector<128x256xf32>
    %c0_4 = arith.constant 0 : index
    %c0_5 = arith.constant 0 : index
    %9 = vector.load %arg6[%c0_4, %c0_5] : memref<128x256xf32, #tpu.memory_space<vmem>>, vector<128x256xf32>
    tpu.vector_store %arg6[%c0_4, %c0_5], %8 {strides = array<i32>} : memref<128x256xf32, #tpu.memory_space<vmem>>, vector<128x256xf32>,
    return
  }
  func.func @transform_0(%arg0: i32, %arg1: i32, %arg2: i32) -> (i32, i32) {
    %c0_i32 = arith.constant 0 : i32
    return %arg0, %arg2 : i32, i32
  }
  func.func @transform_1(%arg0: i32, %arg1: i32, %arg2: i32) -> (i32, i32) {
    %c0_i32 = arith.constant 0 : i32
    return %arg2, %arg1 : i32, i32
  }
  func.func @transform_2(%arg0: i32, %arg1: i32, %arg2: i32) -> (i32, i32) {
    %c0_i32 = arith.constant 0 : i32
    %c0_i32_0 = arith.constant 0 : i32
    %c0_i32_1 = arith.constant 0 : i32
    return %c0_i32, %c0_i32_0 : i32, i32
  }
  func.func @transform_3(%arg0: i32, %arg1: i32, %arg2: i32) -> (i32, i32) {
    %c0_i32 = arith.constant 0 : i32
    return %arg0, %arg1 : i32, i32
  }
}

</mosaic_0001>

<bundles_post_ra>
// kernel: linear_forward.1
= control target key start
LH: loop header
LB: loop body
LE: loop exit
PB: predicated region body
PF: predicated region fallthrough
CT: control target
= control target key end

     0   :  { %8 = vsyncpa [#allocation3], 0  ;;  %s2126_s0 = inlined_call_operand.vmem [shape: bf16[256,512], index: 0, kind: input, shape index: {}]   ;;  %s2127_s1 = inlined_call_operand.vmem [shape: bf16[512,256], index: 1, kind: input, shape index: {}]   ;;  %s2128_s2 = inlined_call_operand.vmem [shape: f32[1,256], index: 2, kind: input, shape index: {}]   ;;  %s2129_s3 = inlined_call_operand.hbm [shape: f32[256,256], index: 3, kind: output, shape index: {}]  }
   0x1   :  { %10 = vsyncpa [#allocation3 + $0x1], 0  ;;  %s1708_s12 = smov 0   ;;  %s1710_s13 = smov 0  }
   0x2   :  { %s1712_s14 = smov 0   ;;  %s1714_s15 = smov 0  }
   0x3   :  { %s1716_s16 = smov 0   ;;  %s1718_s17 = smov 0  }
   0x4 LB: > { %s1225_s18 = sadd.s32 4294967295, %s1683_s17   ;;  %s1226_s19 = sadd.s32 4294967294, %s1683_s17   ;;  %s1683_s17 = sphi %s1718_s17, %s16_s17   ;;  %s1679_s16 = sphi %s1716_s16, %s2136_s16   ;;  %s1675_s15 = sphi %s1714_s15, %s2135_s15   ;;  %s1671_s14 = sphi %s1712_s14, %s2134_s14   ;;  %s1667_s13 = sphi %s1710_s13, %s2133_s13   ;;  %s1663_s12 = sphi %s1708_s12, %s2132_s12  }
   0x5   : > { %s35_s20 = sadd.s32 1, %s1679_s16  ;;  %s121_s21 = sadd.s32 1, %s1671_s14 }
   0x6   : > { %p37_p0 = scmp.ge.s32.totalorder %s35_s20, 2  ;;  %p131_p1 = scmp.ne.s32.totalorder %s1671_s14, %s1667_s13 }
   0x7   : > { %p132_p2 = scmp.eq.s32.totalorder %s1225_s18, 1  ;;  %p137_p3 = scmp.ne.s32.totalorder %s1667_s13, %s1663_s12 }
   0x8   : > { %s2138_s20 = smov (%p37_p0, %s35_s20), 0  ;;  %p138_p5 = scmp.eq.s32.totalorder %s1226_s19, 1 }
   0x9   : > { %p1748_p4 = por %p132_p2, %p131_p1  ;;  %s116_s23 = ssub.s32 %s1679_s16, %s2138_s20 }
   0xa   : > { %p1230_p6 = scmp.ge.s32.totalorder %s1683_s17, 1  ;;  %p119_p7 = scmp.eq.s32.totalorder %s116_s23, 0 }
   0xb   : > { %p1755_p8 = por %p138_p5, %p137_p3  ;;  %p189_p9 = scmp.lt.s32.totalorder %s1683_s17, 3 }
   0xc   : > { %s1761_s25 = scalar_select %p119_p7, %s1671_s14, %s121_s21  }
   0xd   : > { %p190_p10 = pnand %p1230_p6, %p189_p9 }
   0xe   : > { %v1461_v0 = vld [vmem:[%s2127_s1 + $0x4] ss:$8 sps:$4 sm:$0xff] (!%p190_p10)   ;;  %v1465_v2 = vld [vmem:[%s2127_s1] ss:$8 sps:$4 sm:$0xff] (!%p190_p10)   ;;  %v1467_v4 = vld [vmem:[%s2127_s1 + $0x14] ss:$8 sps:$4 sm:$0xff] (!%p190_p10)  }
   0xf   : > { %193 = sbr.rel (%p190_p10) target bundleno = 369 (0x171), region = 32  ;;  %v1463_v1 = vld [vmem:[%s2127_s1 + $0x104] ss:$8 sps:$4 sm:$0xff] (!%p190_p10)   ;;  %846 = vmatprep.subr.bf16.mxu1 (!%p190_p10), %v1461_v0  ;;  %v1466_v3 = vld [vmem:[%s2127_s1 + $0x100] ss:$8 sps:$4 sm:$0xff] (!%p190_p10)   ;;  %s1232_s8 = sshll.u32 (!%p190_p10), %s1675_s15, 4 }
  0x10   : > { %959 = vmatprep.subr.bf16.mxu0 (!%p190_p10), %v1463_v1  ;;  %847 = vmatpush1.bf16.msra.mxu1 (!%p190_p10), %v1465_v2  ;;  %v1469_v5 = vld [vmem:[%s2127_s1 + $0x114] ss:$8 sps:$4 sm:$0xff] (!%p190_p10)   ;;  %v1471_v6 = vld [vmem:[%s2127_s1 + $0x10] ss:$8 sps:$4 sm:$0xff] (!%p190_p10)   ;;  %v1473_v8 = vld [vmem:[%s2127_s1 + $0x24] ss:$8 sps:$4 sm:$0xff] (!%p190_p10)  }
  0x11   : > { %960 = vmatpush1.bf16.msra.mxu0 (!%p190_p10), %v1466_v3  ;;  %848 = vmatprep.subr.bf16.mxu1 (!%p190_p10), %v1467_v4  ;;  %v1472_v7 = vld [vmem:[%s2127_s1 + $0x110] ss:$8 sps:$4 sm:$0xff] (!%p190_p10)   ;;  %v1475_v9 = vld [vmem:[%s2127_s1 + $0x124] ss:$8 sps:$4 sm:$0xff] (!%p190_p10)   ;;  %v1477_v10 = vld [vmem:[%s2127_s1 + $0x20] ss:$8 sps:$4 sm:$0xff] (!%p190_p10)  }
  0x12   : > { %961 = vmatprep.subr.bf16.mxu0 (!%p190_p10), %v1469_v5  ;;  %v1478_v11 = vld [vmem:[%s2127_s1 + $0x120] ss:$8 sps:$4 sm:$0xff] (!%p190_p10)   ;;  %v1479_v12 = vld [vmem:[%s2127_s1 + $0x34] ss:$8 sps:$4 sm:$0xff] (!%p190_p10)   ;;  %v1483_v14 = vld [vmem:[%s2127_s1 + $0x30] ss:$8 sps:$4 sm:$0xff] (!%p190_p10)  }
  0x13   : > { %v1481_v13 = vld [vmem:[%s2127_s1 + $0x134] ss:$8 sps:$4 sm:$0xff] (!%p190_p10)   ;;  %v1484_v15 = vld [vmem:[%s2127_s1 + $0x130] ss:$8 sps:$4 sm:$0xff] (!%p190_p10)   ;;  %v1485_v16 = vld [vmem:[%s2127_s1 + $0x44] ss:$8 sps:$4 sm:$0xff] (!%p190_p10)  }
  0x14   : > { %849 = vmatpush1.bf16.msra.mxu1 (!%p190_p10), %v1471_v6  ;;  %v1487_v17 = vld [vmem:[%s2127_s1 + $0x144] ss:$8 sps:$4 sm:$0xff] (!%p190_p10)   ;;  %v1489_v18 = vld [vmem:[%s2127_s1 + $0x40] ss:$8 sps:$4 sm:$0xff] (!%p190_p10)   ;;  %v1491_v20 = vld [vmem:[%s2127_s1 + $0x54] ss:$8 sps:$4 sm:$0xff] (!%p190_p10)  }
  0x15   : > { %962 = vmatpush1.bf16.msra.mxu0 (!%p190_p10), %v1472_v7  ;;  %850 = vmatprep.subr.bf16.mxu1 (!%p190_p10), %v1473_v8  ;;  %v1490_v19 = vld [vmem:[%s2127_s1 + $0x140] ss:$8 sps:$4 sm:$0xff] (!%p190_p10)   ;;  %v1493_v21 = vld [vmem:[%s2127_s1 + $0x154] ss:$8 sps:$4 sm:$0xff] (!%p190_p10)   ;;  %v1495_v22 = vld [vmem:[%s2127_s1 + $0x50] ss:$8 sps:$4 sm:$0xff] (!%p190_p10)  }
  0x16   : > { %963 = vmatprep.subr.bf16.mxu0 %v1475_v9  ;;  %v1496_v23 = vld [vmem:[%s2127_s1 + $0x150] ss:$8 sps:$4 sm:$0xff]   ;;  %v1497_v24 = vld [vmem:[%s2127_s1 + $0x64] ss:$8 sps:$4 sm:$0xff]   ;;  %v1501_v26 = vld [vmem:[%s2127_s1 + $0x60] ss:$8 sps:$4 sm:$0xff]  }
  0x17   : > { %v1499_v25 = vld [vmem:[%s2127_s1 + $0x164] ss:$8 sps:$4 sm:$0xff]   ;;  %v1502_v27 = vld [vmem:[%s2127_s1 + $0x160] ss:$8 sps:$4 sm:$0xff]   ;;  %v1503_v28 = vld [vmem:[%s2127_s1 + $0x74] ss:$8 sps:$4 sm:$0xff]  }
  0x18   : > { %851 = vmatpush1.bf16.msra.mxu1 %v1477_v10  ;;  %v1505_v29 = vld [vmem:[%s2127_s1 + $0x174] ss:$8 sps:$4 sm:$0xff]   ;;  %v1507_v30 = vld [vmem:[%s2127_s1 + $0x70] ss:$8 sps:$4 sm:$0xff]   ;;  %v1509_v32 = vld [vmem:[%s2127_s1 + $0x84] ss:$8 sps:$4 sm:$0xff]  }
  0x19   : > { %964 = vmatpush1.bf16.msra.mxu0 %v1478_v11  ;;  %852 = vmatprep.subr.bf16.mxu1 %v1479_v12  ;;  %v1508_v31 = vld [vmem:[%s2127_s1 + $0x170] ss:$8 sps:$4 sm:$0xff]   ;;  %v1511_v33 = vld [vmem:[%s2127_s1 + $0x184] ss:$8 sps:$4 sm:$0xff]   ;;  %p230_p11 = scmp.lt.s32.totalorder %s1232_s8, 31  ;;  %s1339_s30 = sshll.u32 %s1675_s15, 12 }
  0x1a   : > { %965 = vmatprep.subr.bf16.mxu0 %v1481_v13  ;;  %v1513_v34 = vld [vmem:[%s2127_s1 + $0x80] ss:$8 sps:$4 sm:$0xff]   ;;  %v1515_v36 = vld [vmem:[%s2127_s1 + $0x94] ss:$8 sps:$4 sm:$0xff]   ;;  %v1519_v38 = vld [vmem:[%s2127_s1 + $0x90] ss:$8 sps:$4 sm:$0xff]   ;;  %s2071_s7 = scalar_lea.hbm %s2129_s3, %s1339_s30 }
  0x1b   : > { %v1514_v35 = vld [vmem:[%s2127_s1 + $0x180] ss:$8 sps:$4 sm:$0xff]   ;;  %v1517_v37 = vld [vmem:[%s2127_s1 + $0x194] ss:$8 sps:$4 sm:$0xff]   ;;  %s2140_s8 = smov (!%p230_p11, %s1232_s8), 31 }
  0x1c   : > { %853 = vmatpush1.bf16.msra.mxu1 %v1483_v14  ;;  %v1520_v39 = vld [vmem:[%s2127_s1 + $0x190] ss:$8 sps:$4 sm:$0xff]   ;;  %v1521_v40 = vld [vmem:[%s2127_s1 + $0xa4] ss:$8 sps:$4 sm:$0xff]   ;;  %s1337_s27 = sshll.u32 %s2140_s8, 4  ;;  %s1685_s8 = smov [#allocation2]  }
  0x1d   : > { %966 = vmatpush1.bf16.msra.mxu0 %v1484_v15  ;;  %854 = vmatprep.subr.bf16.mxu1 %v1485_v16  ;;  %v1523_v41 = vld [vmem:[%s2127_s1 + $0x1a4] ss:$8 sps:$4 sm:$0xff]   ;;  %v1525_v42 = vld [vmem:[%s2127_s1 + $0xa0] ss:$8 sps:$4 sm:$0xff]   ;;  %v1527_v44 = vld [vmem:[%s2127_s1 + $0xb4] ss:$8 sps:$4 sm:$0xff]   ;;  %s1902_s10 = scalar_lea.vmem %s2126_s0, %s1337_s27 }
  0x1e   : > { %967 = vmatprep.subr.bf16.mxu0 %v1487_v17  ;;  %v1526_v43 = vld [vmem:[%s2127_s1 + $0x1a0] ss:$8 sps:$4 sm:$0xff]   ;;  %v1529_v45 = vld [vmem:[%s2127_s1 + $0x1b4] ss:$8 sps:$4 sm:$0xff]   ;;  %v1531_v46 = vld [vmem:[%s2127_s1 + $0xb0] ss:$8 sps:$4 sm:$0xff]  }
  0x1f   : > { %v1532_v47 = vld [vmem:[%s2127_s1 + $0x1b0] ss:$8 sps:$4 sm:$0xff]   ;;  %v1533_v48 = vld [vmem:[%s2127_s1 + $0xc4] ss:$8 sps:$4 sm:$0xff]   ;;  %v1537_v52 = vld [vmem:[%s2127_s1 + $0xc0] ss:$8 sps:$4 sm:$0xff]  }
  0x20   : > { %855 = vmatpush1.bf16.msra.mxu1 %v1489_v18  ;;  %v1559_v49 = vld [vmem:[%s1902_s10 + $0x4] ss:$16 sps:$4 sm:$0xff]   ;;  %v1562_v51 = vld [vmem:[%s1902_s10 + $0xc] ss:$16 sps:$4 sm:$0xff]   ;;  %v1538_v53 = vld [vmem:[%s2127_s1 + $0x1c0] ss:$8 sps:$4 sm:$0xff]  }
  0x21   : > { %968 = vmatpush1.bf16.msra.mxu0 %v1490_v19  ;;  %856 = vmatprep.subr.bf16.mxu1 %v1491_v20  ;;  %v1535_v50 = vld [vmem:[%s2127_s1 + $0x1c4] ss:$8 sps:$4 sm:$0xff]   ;;  %v1539_v54 = vld [vmem:[%s2127_s1 + $0xd4] ss:$8 sps:$4 sm:$0xff]   ;;  %v1543_v56 = vld [vmem:[%s2127_s1 + $0xd0] ss:$8 sps:$4 sm:$0xff]  }
  0x22   : > { %969 = vmatprep.subr.bf16.mxu0 %v1493_v21  ;;  %878 = vmatprep.mubr.bf16.mxu1 %v1559_v49  ;;  %v1541_v55 = vld [vmem:[%s2127_s1 + $0x1d4] ss:$8 sps:$4 sm:$0xff]   ;;  %v1544_v57 = vld [vmem:[%s2127_s1 + $0x1d0] ss:$8 sps:$4 sm:$0xff]   ;;  %v1545_v58 = vld [vmem:[%s2127_s1 + $0xe4] ss:$8 sps:$4 sm:$0xff]  }
  0x23   : > { %991 = vmatprep.mubr.bf16.mxu0 %v1562_v51  ;;  %v1547_v59 = vld [vmem:[%s2127_s1 + $0x1e4] ss:$8 sps:$4 sm:$0xff]   ;;  %v1549_v60 = vld [vmem:[%s2127_s1 + $0xe0] ss:$8 sps:$4 sm:$0xff]   ;;  %v1551_v62 = vld [vmem:[%s2127_s1 + $0xf4] ss:$8 sps:$4 sm:$0xff]  }
  0x24   : > { %857 = vmatpush1.bf16.msra.mxu1 %v1495_v22  ;;  %v1550_v61 = vld [vmem:[%s2127_s1 + $0x1e0] ss:$8 sps:$4 sm:$0xff]   ;;  %v1553_v63 = vld [vmem:[%s2127_s1 + $0x1f4] ss:$8 sps:$4 sm:$0xff]   ;;  %v1555_v0 = vld [vmem:[%s2127_s1 + $0xf0] ss:$8 sps:$4 sm:$0xff]  }
  0x25   : > { %970 = vmatpush1.bf16.msra.mxu0 %v1496_v23  ;;  %858 = vmatprep.subr.bf16.mxu1 %v1497_v24  ;;  %v1556_v1 = vld [vmem:[%s2127_s1 + $0x1f0] ss:$8 sps:$4 sm:$0xff]   ;;  %v1563_v4 = vld [vmem:[%s1902_s10 + $0x24] ss:$16 sps:$4 sm:$0xff]   ;;  %v1565_v5 = vld [vmem:[%s1902_s10 + $0x2c] ss:$16 sps:$4 sm:$0xff]  }
  0x26   : > { %971 = vmatprep.subr.bf16.mxu0 %v1499_v25  ;;  %v1557_v2 = vld [vmem:[%s1902_s10] ss:$16 sps:$4 sm:$0xff]   ;;  %v1560_v3 = vld [vmem:[%s1902_s10 + $0x8] ss:$16 sps:$4 sm:$0xff]   ;;  %v1569_v8 = vld [vmem:[%s1902_s10 + $0x44] ss:$16 sps:$4 sm:$0xff]  }
  0x27   : > { %v1567_v6 = vld [vmem:[%s1902_s10 + $0x20] ss:$16 sps:$4 sm:$0xff]   ;;  %v1568_v7 = vld [vmem:[%s1902_s10 + $0x28] ss:$16 sps:$4 sm:$0xff]   ;;  %v1571_v9 = vld [vmem:[%s1902_s10 + $0x4c] ss:$16 sps:$4 sm:$0xff]  }
  0x28   : > { %859 = vmatpush1.bf16.msra.mxu1 %v1501_v26  ;;  %v1573_v10 = vld [vmem:[%s1902_s10 + $0x40] ss:$16 sps:$4 sm:$0xff]   ;;  %v1574_v11 = vld [vmem:[%s1902_s10 + $0x48] ss:$16 sps:$4 sm:$0xff]   ;;  %v1575_v12 = vld [vmem:[%s1902_s10 + $0x64] ss:$16 sps:$4 sm:$0xff]  }
  0x29   : > { %972 = vmatpush1.bf16.msra.mxu0 %v1502_v27  ;;  %860 = vmatprep.subr.bf16.mxu1 %v1503_v28  ;;  %v1577_v13 = vld [vmem:[%s1902_s10 + $0x6c] ss:$16 sps:$4 sm:$0xff]   ;;  %v1579_v14 = vld [vmem:[%s1902_s10 + $0x60] ss:$16 sps:$4 sm:$0xff]   ;;  %v1580_v15 = vld [vmem:[%s1902_s10 + $0x68] ss:$16 sps:$4 sm:$0xff]  }
  0x2a   : > { %973 = vmatprep.subr.bf16.mxu0 %v1505_v29  ;;  %v1581_v16 = vld [vmem:[%s1902_s10 + $0x84] ss:$16 sps:$4 sm:$0xff]   ;;  %v1583_v17 = vld [vmem:[%s1902_s10 + $0x8c] ss:$16 sps:$4 sm:$0xff]   ;;  %v1585_v18 = vld [vmem:[%s1902_s10 + $0x80] ss:$16 sps:$4 sm:$0xff]  }
  0x2b   : > { %v1586_v19 = vld [vmem:[%s1902_s10 + $0x88] ss:$16 sps:$4 sm:$0xff]   ;;  %v1587_v20 = vld [vmem:[%s1902_s10 + $0xa4] ss:$16 sps:$4 sm:$0xff]   ;;  %v1589_v21 = vld [vmem:[%s1902_s10 + $0xac] ss:$16 sps:$4 sm:$0xff]  }
  0x2c   : > { %861 = vmatpush1.bf16.msra.mxu1 %v1507_v30  ;;  %v1591_v22 = vld [vmem:[%s1902_s10 + $0xa0] ss:$16 sps:$4 sm:$0xff]   ;;  %v1592_v23 = vld [vmem:[%s1902_s10 + $0xa8] ss:$16 sps:$4 sm:$0xff]   ;;  %v1593_v24 = vld [vmem:[%s1902_s10 + $0xc4] ss:$16 sps:$4 sm:$0xff]  }
  0x2d   : > { %974 = vmatpush1.bf16.msra.mxu0 %v1508_v31  ;;  %862 = vmatprep.subr.bf16.mxu1 %v1509_v32  ;;  %v1595_v25 = vld [vmem:[%s1902_s10 + $0xcc] ss:$16 sps:$4 sm:$0xff]   ;;  %v1597_v26 = vld [vmem:[%s1902_s10 + $0xc0] ss:$16 sps:$4 sm:$0xff]   ;;  %v1598_v27 = vld [vmem:[%s1902_s10 + $0xc8] ss:$16 sps:$4 sm:$0xff]   ;;  %v356_v32 = vlaneseq }
  0x2e   : > { %975 = vmatprep.subr.bf16.mxu0 %v1511_v33  ;;  %v1599_v28 = vld [vmem:[%s1902_s10 + $0xe4] ss:$16 sps:$4 sm:$0xff]   ;;  %v1601_v29 = vld [vmem:[%s1902_s10 + $0xec] ss:$16 sps:$4 sm:$0xff]   ;;  %v1603_v30 = vld [vmem:[%s1902_s10 + $0xe0] ss:$16 sps:$4 sm:$0xff]  }
  0x2f   : > { %v1604_v31 = vld [vmem:[%s1902_s10 + $0xe8] ss:$16 sps:$4 sm:$0xff]   ;;  %v357_v33 = vshrl.u32 %v356_v32, 7  ;;  %s225_s27 = sand.u32 1, %s1667_s13   ;;  %s1609_s11 = sshll.u32 %s1685_s8, 4  ;;  %s1610_s11 = int_to_ptr.vmem [resolvable:$false] %s1609_s11 }
  0x30   : > { %863 = vmatpush1.bf16.msra.mxu1 %v1513_v34  ;;  %s1231_s29 = sshll.u32 %s225_s27, 8  ;;  %s2080_s15 = scalar_lea.sflag [#allocation3], %s225_s27 }
  0x31   : > { %976 = vmatpush1.bf16.msra.mxu0 %v1514_v35  ;;  %864 = vmatprep.subr.bf16.mxu1 %v1515_v36  ;;  %v358_v34 = vsub.s32 0, %v357_v33  ;;  %v354_v35 = vld [vmem:[%s2128_s2] sm:$0x3]  ;;  %v362_v36 = vsub.s32 1, %v357_v33  ;;  %s2007_s10 = scalar_lea.vmem [#allocation2], %s1231_s29  ;;  %s1611_s18 = scalar_lea.vmem %s1610_s11, 8192 }
  0x32   : > { %977 = vmatprep.subr.bf16.mxu0 %v1517_v37  ;;  %s1121_s4 = sshll.u32 %s2007_s10, 4  ;;  %s2073_s4 = int_to_ptr.vmem [resolvable:$true] %s1121_s4 }
  0x33   : > { %v1997_v37 = vrot.slane %v354_v35, %v358_v34  ;;  %s1605_s9 = scalar_lea.vmem %s2073_s4, 4096  ;;  %p1612_p1 = scmp.lt.s32.totalorder %s2073_s4, %s1610_s11 }
  0x34   : > { %865 = vmatpush1.bf16.msra.mxu1 %v1519_v38  ;;  %v1999_v38 = vrot.slane %v354_v35, %v362_v36  ;;  %p1606_p12 = scmp.ne.s32.totalorder %s2073_s4, %s1605_s9  ;;  %p1613_p2 = scmp.lt.s32.totalorder %s1611_s18, %s1605_s9 }
  0x35   : > { %978 = vmatpush1.bf16.msra.mxu0 %v1520_v39  ;;  %866 = vmatprep.subr.bf16.mxu1 %v1521_v40 }
  0x36   : > { %979 = vmatprep.subr.bf16.mxu0 %v1523_v41  ;;  %p1607_p13 = pnand %p1606_p12, %p1748_p4  ;;  %p1614_p3 = por %p1613_p2, %p1612_p1 }
  0x38   : > { %867 = vmatpush1.bf16.msra.mxu1 %v1525_v42  ;;  %p1608_p0 = pneg %p1607_p13 }
  0x39   : > { %980 = vmatpush1.bf16.msra.mxu0 %v1526_v43  ;;  %868 = vmatprep.subr.bf16.mxu1 %v1527_v44 }
  0x3a   : > { %981 = vmatprep.subr.bf16.mxu0 %v1529_v45  ;;  %p1615_p5 = pnand %p1614_p3, %p1608_p0 }
  0x3c   : > { %869 = vmatpush1.bf16.msra.mxu1 %v1531_v46 }
  0x3d   : > { %982 = vmatpush1.bf16.msra.mxu0 %v1532_v47  ;;  %870 = vmatprep.subr.bf16.mxu1 %v1533_v48 }
  0x3e   : > { %983 = vmatprep.subr.bf16.mxu0 %v1535_v50 }
  0x40   : > { %871 = vmatpush1.bf16.msra.mxu1 %v1537_v52 }
  0x41   : > { %984 = vmatpush1.bf16.msra.mxu0 %v1538_v53  ;;  %872 = vmatprep.subr.bf16.mxu1 %v1539_v54 }
  0x42   : > { %985 = vmatprep.subr.bf16.mxu0 %v1541_v55 }
  0x44   : > { %873 = vmatpush1.bf16.msra.mxu1 %v1543_v56 }
  0x45   : > { %986 = vmatpush1.bf16.msra.mxu0 %v1544_v57  ;;  %874 = vmatprep.subr.bf16.mxu1 %v1545_v58 }
  0x46   : > { %987 = vmatprep.subr.bf16.mxu0 %v1547_v59 }
  0x48   : > { %875 = vmatpush1.bf16.msra.mxu1 %v1549_v60 }
  0x49   : > { %988 = vmatpush1.bf16.msra.mxu0 %v1550_v61  ;;  %876 = vmatprep.subr.bf16.mxu1 %v1551_v62 }
  0x4a   : > { %989 = vmatprep.subr.bf16.mxu0 %v1553_v63 }
  0x4c   : > { %877 = vmatpush1.bf16.msra.mxu1 %v1555_v0 }
  0x4d   : > { %990 = vmatpush1.bf16.msra.mxu0 %v1556_v1 }
  0x4f   : > { %879 = vmatmul.mubr.bf16.vlgmr.msra.gmra.mrb[0].mxu1 %v1557_v2 }
  0x50   : > { %992 = vmatmul.mubr.bf16.vlgmr.msra.gmra.mrb[0].mxu0 %v1560_v3  ;;  %888 = vmatprep.mubr.bf16.mxu1 %v1563_v4 }
  0x51   : > { %1001 = vmatprep.mubr.bf16.mxu0 %v1565_v5 }
  0x57   : > { %889 = vmatmul.mubr.bf16.gmra.mrb[4].mxu1 %v1567_v6 }
  0x58   : > { %1002 = vmatmul.mubr.bf16.gmra.mrb[4].mxu0 %v1568_v7  ;;  %898 = vmatprep.mubr.bf16.mxu1 %v1569_v8 }
  0x59   : > { %1011 = vmatprep.mubr.bf16.mxu0 %v1571_v9 }
  0x5f   : > { %899 = vmatmul.mubr.bf16.gmra.mrb[8].mxu1 %v1573_v10 }
  0x60   : > { %1012 = vmatmul.mubr.bf16.gmra.mrb[8].mxu0 %v1574_v11  ;;  %908 = vmatprep.mubr.bf16.mxu1 %v1575_v12 }
  0x61   : > { %1021 = vmatprep.mubr.bf16.mxu0 %v1577_v13 }
  0x67   : > { %909 = vmatmul.mubr.bf16.gmra.mrb[12].mxu1 %v1579_v14 }
  0x68   : > { %1022 = vmatmul.mubr.bf16.gmra.mrb[12].mxu0 %v1580_v15  ;;  %918 = vmatprep.mubr.bf16.mxu1 %v1581_v16 }
  0x69   : > { %1031 = vmatprep.mubr.bf16.mxu0 %v1583_v17 }
  0x6f   : > { %919 = vmatmul.mubr.bf16.gmra.mrb[16].mxu1 %v1585_v18 }
  0x70   : > { %1032 = vmatmul.mubr.bf16.gmra.mrb[16].mxu0 %v1586_v19  ;;  %928 = vmatprep.mubr.bf16.mxu1 %v1587_v20 }
  0x71   : > { %1041 = vmatprep.mubr.bf16.mxu0 %v1589_v21 }
  0x77   : > { %929 = vmatmul.mubr.bf16.gmra.mrb[20].mxu1 %v1591_v22 }
  0x78   : > { %1042 = vmatmul.mubr.bf16.gmra.mrb[20].mxu0 %v1592_v23  ;;  %938 = vmatprep.mubr.bf16.mxu1 %v1593_v24 }
  0x79   : > { %1051 = vmatprep.mubr.bf16.mxu0 %v1595_v25 }
  0x7f   : > { %939 = vmatmul.mubr.bf16.gmra.mrb[24].mxu1 %v1597_v26 }
  0x80   : > { %1052 = vmatmul.mubr.bf16.gmra.mrb[24].mxu0 %v1598_v27  ;;  %948 = vmatprep.mubr.bf16.mxu1 %v1599_v28 }
  0x81   : > { %1061 = vmatprep.mubr.bf16.mxu0 %v1601_v29 }
  0x87   : > { %949 = vmatmul.mubr.bf16.gmra.mrb[28].mxu1 %v1603_v30 }
  0x88   : > { %1062 = vmatmul.mubr.bf16.gmra.mrb[28].mxu0 %v1604_v31 }
 0x122   : > { %v880_v39 = vpop.f32.mrb[0].mxu1 }
 0x123   : > { %v993_v40 = vpop.f32.mrb[0].mxu0  ;;  %v881_v41 = vadd.f32 %v880_v39, %v1997_v37  ;;  %v882_v42 = vpop.f32.mrb[1].mxu1 }
 0x124   : > { %v995_v43 = vpop.f32.mrb[1].mxu0  ;;  %v883_v44 = vadd.f32 %v882_v42, %v1999_v38  ;;  %v884_v45 = vpop.f32.mrb[2].mxu1 }
 0x125   : > { %v997_v46 = vpop.f32.mrb[2].mxu0  ;;  %v994_v47 = vadd.f32 %v993_v40, %v881_v41  ;;  %v885_v48 = vadd.f32 %v884_v45, %v1997_v37  ;;  %v886_v49 = vpop.f32.mrb[3].mxu1 }
 0x126   : > { %v999_v50 = vpop.f32.mrb[3].mxu0  ;;  %v996_v51 = vadd.f32 %v995_v43, %v883_v44  ;;  %v887_v52 = vadd.f32 %v886_v49, %v1999_v38 }
 0x127   : > { %1072 = vst [vmem:[%s2007_s10] sm:$0xff] %v994_v47  ;;  %v998_v53 = vadd.f32 %v997_v46, %v885_v48 }
 0x128   : > { %1073 = vst [vmem:[%s2007_s10 + $0x8] sm:$0xff] %v996_v51  ;;  %v1000_v54 = vadd.f32 %v999_v50, %v887_v52 }
 0x129   : > { %1074 = vst [vmem:[%s2007_s10 + $0x10] sm:$0xff] %v998_v53 }
 0x12a   : > { %1075 = vst [vmem:[%s2007_s10 + $0x18] sm:$0xff] %v1000_v54  ;;  %v890_v55 = vpop.f32.mrb[4].mxu1 }
 0x12b   : > { %v1003_v56 = vpop.f32.mrb[4].mxu0  ;;  %v891_v57 = vadd.f32 %v890_v55, %v1997_v37  ;;  %v892_v58 = vpop.f32.mrb[5].mxu1 }
 0x12c   : > { %v1005_v59 = vpop.f32.mrb[5].mxu0  ;;  %v893_v60 = vadd.f32 %v892_v58, %v1999_v38  ;;  %v894_v61 = vpop.f32.mrb[6].mxu1 }
 0x12d   : > { %v1007_v62 = vpop.f32.mrb[6].mxu0  ;;  %v1004_v63 = vadd.f32 %v1003_v56, %v891_v57  ;;  %v895_v0 = vadd.f32 %v894_v61, %v1997_v37  ;;  %v896_v1 = vpop.f32.mrb[7].mxu1 }
 0x12e   : > { %v1009_v2 = vpop.f32.mrb[7].mxu0  ;;  %v1006_v3 = vadd.f32 %v1005_v59, %v893_v60  ;;  %v897_v4 = vadd.f32 %v896_v1, %v1999_v38 }
 0x12f   : > { %1076 = vst [vmem:[%s2007_s10 + $0x20] sm:$0xff] %v1004_v63  ;;  %v1008_v5 = vadd.f32 %v1007_v62, %v895_v0 }
 0x130   : > { %1077 = vst [vmem:[%s2007_s10 + $0x28] sm:$0xff] %v1006_v3  ;;  %v1010_v6 = vadd.f32 %v1009_v2, %v897_v4 }
 0x131   : > { %1078 = vst [vmem:[%s2007_s10 + $0x30] sm:$0xff] %v1008_v5 }
 0x132   : > { %1079 = vst [vmem:[%s2007_s10 + $0x38] sm:$0xff] %v1010_v6  ;;  %v900_v7 = vpop.f32.mrb[8].mxu1 }
 0x133   : > { %v1013_v8 = vpop.f32.mrb[8].mxu0  ;;  %v901_v9 = vadd.f32 %v900_v7, %v1997_v37  ;;  %v902_v10 = vpop.f32.mrb[9].mxu1 }
 0x134   : > { %v1015_v11 = vpop.f32.mrb[9].mxu0  ;;  %v903_v12 = vadd.f32 %v902_v10, %v1999_v38  ;;  %v904_v13 = vpop.f32.mrb[10].mxu1 }
 0x135   : > { %v1017_v14 = vpop.f32.mrb[10].mxu0  ;;  %v1014_v15 = vadd.f32 %v1013_v8, %v901_v9  ;;  %v905_v16 = vadd.f32 %v904_v13, %v1997_v37  ;;  %v906_v17 = vpop.f32.mrb[11].mxu1 }
 0x136   : > { %v1019_v18 = vpop.f32.mrb[11].mxu0  ;;  %v1016_v19 = vadd.f32 %v1015_v11, %v903_v12  ;;  %v907_v20 = vadd.f32 %v906_v17, %v1999_v38 }
 0x137   : > { %1080 = vst [vmem:[%s2007_s10 + $0x40] sm:$0xff] %v1014_v15  ;;  %v1018_v21 = vadd.f32 %v1017_v14, %v905_v16 }
 0x138   : > { %1081 = vst [vmem:[%s2007_s10 + $0x48] sm:$0xff] %v1016_v19  ;;  %v1020_v22 = vadd.f32 %v1019_v18, %v907_v20 }
 0x139   : > { %1082 = vst [vmem:[%s2007_s10 + $0x50] sm:$0xff] %v1018_v21 }
 0x13a   : > { %1083 = vst [vmem:[%s2007_s10 + $0x58] sm:$0xff] %v1020_v22  ;;  %v910_v23 = vpop.f32.mrb[12].mxu1 }
 0x13b   : > { %v1023_v24 = vpop.f32.mrb[12].mxu0  ;;  %v911_v25 = vadd.f32 %v910_v23, %v1997_v37  ;;  %v912_v26 = vpop.f32.mrb[13].mxu1 }
 0x13c   : > { %v1025_v27 = vpop.f32.mrb[13].mxu0  ;;  %v913_v28 = vadd.f32 %v912_v26, %v1999_v38  ;;  %v914_v29 = vpop.f32.mrb[14].mxu1 }
 0x13d   : > { %v1027_v30 = vpop.f32.mrb[14].mxu0  ;;  %v1024_v31 = vadd.f32 %v1023_v24, %v911_v25  ;;  %v915_v32 = vadd.f32 %v914_v29, %v1997_v37  ;;  %v916_v33 = vpop.f32.mrb[15].mxu1 }
 0x13e   : > { %v1029_v34 = vpop.f32.mrb[15].mxu0  ;;  %v1026_v35 = vadd.f32 %v1025_v27, %v913_v28  ;;  %v917_v36 = vadd.f32 %v916_v33, %v1999_v38 }
 0x13f   : > { %1084 = vst [vmem:[%s2007_s10 + $0x60] sm:$0xff] %v1024_v31  ;;  %v1028_v39 = vadd.f32 %v1027_v30, %v915_v32 }
 0x140   : > { %1085 = vst [vmem:[%s2007_s10 + $0x68] sm:$0xff] %v1026_v35  ;;  %v1030_v40 = vadd.f32 %v1029_v34, %v917_v36 }
 0x141   : > { %1086 = vst [vmem:[%s2007_s10 + $0x70] sm:$0xff] %v1028_v39 }
 0x142   : > { %1087 = vst [vmem:[%s2007_s10 + $0x78] sm:$0xff] %v1030_v40  ;;  %v920_v41 = vpop.f32.mrb[16].mxu1 }
 0x143   : > { %v1033_v42 = vpop.f32.mrb[16].mxu0  ;;  %v921_v43 = vadd.f32 %v920_v41, %v1997_v37  ;;  %v922_v44 = vpop.f32.mrb[17].mxu1 }
 0x144   : > { %v1035_v45 = vpop.f32.mrb[17].mxu0  ;;  %v923_v46 = vadd.f32 %v922_v44, %v1999_v38  ;;  %v924_v47 = vpop.f32.mrb[18].mxu1 }
 0x145   : > { %v1037_v48 = vpop.f32.mrb[18].mxu0  ;;  %v1034_v49 = vadd.f32 %v1033_v42, %v921_v43  ;;  %v925_v50 = vadd.f32 %v924_v47, %v1997_v37  ;;  %v926_v51 = vpop.f32.mrb[19].mxu1 }
 0x146   : > { %v1039_v52 = vpop.f32.mrb[19].mxu0  ;;  %v1036_v53 = vadd.f32 %v1035_v45, %v923_v46  ;;  %v927_v54 = vadd.f32 %v926_v51, %v1999_v38 }
 0x147   : > { %1088 = vst [vmem:[%s2007_s10 + $0x80] sm:$0xff] %v1034_v49  ;;  %v1038_v55 = vadd.f32 %v1037_v48, %v925_v50 }
 0x148   : > { %1089 = vst [vmem:[%s2007_s10 + $0x88] sm:$0xff] %v1036_v53  ;;  %v1040_v56 = vadd.f32 %v1039_v52, %v927_v54 }
 0x149   : > { %1090 = vst [vmem:[%s2007_s10 + $0x90] sm:$0xff] %v1038_v55 }
 0x14a   : > { %1091 = vst [vmem:[%s2007_s10 + $0x98] sm:$0xff] %v1040_v56  ;;  %v930_v57 = vpop.f32.mrb[20].mxu1 }
 0x14b   : > { %v1043_v58 = vpop.f32.mrb[20].mxu0  ;;  %v931_v59 = vadd.f32 %v930_v57, %v1997_v37  ;;  %v932_v60 = vpop.f32.mrb[21].mxu1 }
 0x14c   : > { %v1045_v61 = vpop.f32.mrb[21].mxu0  ;;  %v933_v62 = vadd.f32 %v932_v60, %v1999_v38  ;;  %v934_v63 = vpop.f32.mrb[22].mxu1 }
 0x14d   : > { %v1047_v0 = vpop.f32.mrb[22].mxu0  ;;  %v1044_v1 = vadd.f32 %v1043_v58, %v931_v59  ;;  %v935_v2 = vadd.f32 %v934_v63, %v1997_v37  ;;  %v936_v3 = vpop.f32.mrb[23].mxu1 }
 0x14e   : > { %v1049_v4 = vpop.f32.mrb[23].mxu0  ;;  %v1046_v5 = vadd.f32 %v1045_v61, %v933_v62  ;;  %v937_v6 = vadd.f32 %v936_v3, %v1999_v38 }
 0x14f   : > { %1092 = vst [vmem:[%s2007_s10 + $0xa0] sm:$0xff] %v1044_v1  ;;  %v1048_v7 = vadd.f32 %v1047_v0, %v935_v2 }
 0x150   : > { %1093 = vst [vmem:[%s2007_s10 + $0xa8] sm:$0xff] %v1046_v5  ;;  %v1050_v8 = vadd.f32 %v1049_v4, %v937_v6 }
 0x151   : > { %1094 = vst [vmem:[%s2007_s10 + $0xb0] sm:$0xff] %v1048_v7 }
 0x152   : > { %1095 = vst [vmem:[%s2007_s10 + $0xb8] sm:$0xff] %v1050_v8  ;;  %v940_v9 = vpop.f32.mrb[24].mxu1 }
 0x153   : > { %v1053_v10 = vpop.f32.mrb[24].mxu0  ;;  %v941_v11 = vadd.f32 %v940_v9, %v1997_v37  ;;  %v942_v12 = vpop.f32.mrb[25].mxu1 }
 0x154   : > { %v1055_v13 = vpop.f32.mrb[25].mxu0  ;;  %v943_v14 = vadd.f32 %v942_v12, %v1999_v38  ;;  %v944_v15 = vpop.f32.mrb[26].mxu1 }
 0x155   : > { %v1057_v16 = vpop.f32.mrb[26].mxu0  ;;  %v1054_v17 = vadd.f32 %v1053_v10, %v941_v11  ;;  %v945_v18 = vadd.f32 %v944_v15, %v1997_v37  ;;  %v946_v19 = vpop.f32.mrb[27].mxu1 }
 0x156   : > { %v1059_v20 = vpop.f32.mrb[27].mxu0  ;;  %v1056_v21 = vadd.f32 %v1055_v13, %v943_v14  ;;  %v947_v22 = vadd.f32 %v946_v19, %v1999_v38 }
 0x157   : > { %1096 = vst [vmem:[%s2007_s10 + $0xc0] sm:$0xff] %v1054_v17  ;;  %v1058_v23 = vadd.f32 %v1057_v16, %v945_v18 }
 0x158   : > { %1097 = vst [vmem:[%s2007_s10 + $0xc8] sm:$0xff] %v1056_v21  ;;  %v1060_v24 = vadd.f32 %v1059_v20, %v947_v22 }
 0x159   : > { %1098 = vst [vmem:[%s2007_s10 + $0xd0] sm:$0xff] %v1058_v23 }
 0x15a   : > { %1099 = vst [vmem:[%s2007_s10 + $0xd8] sm:$0xff] %v1060_v24  ;;  %v950_v25 = vpop.f32.mrb[28].mxu1 }
 0x15b   : > { %v1063_v26 = vpop.f32.mrb[28].mxu0  ;;  %v951_v27 = vadd.f32 %v950_v25, %v1997_v37  ;;  %v952_v28 = vpop.f32.mrb[29].mxu1 }
 0x15c   : > { %v1065_v29 = vpop.f32.mrb[29].mxu0  ;;  %v953_v30 = vadd.f32 %v952_v28, %v1999_v38  ;;  %v954_v31 = vpop.f32.mrb[30].mxu1 }
 0x15d   : > { %v1067_v32 = vpop.f32.mrb[30].mxu0  ;;  %v1064_v33 = vadd.f32 %v1063_v26, %v951_v27  ;;  %v955_v34 = vadd.f32 %v954_v31, %v1997_v37  ;;  %v956_v35 = vpop.f32.mrb[31].mxu1 }
 0x15e   : > { %v1069_v36 = vpop.f32.mrb[31].mxu0  ;;  %v1066_v39 = vadd.f32 %v1065_v29, %v953_v30  ;;  %v957_v40 = vadd.f32 %v956_v35, %v1999_v38 }
 0x15f   : > { %1100 = vst [vmem:[%s2007_s10 + $0xe0] sm:$0xff] %v1064_v33  ;;  %v1068_v41 = vadd.f32 %v1067_v32, %v955_v34 }
 0x160   : > { %1101 = vst [vmem:[%s2007_s10 + $0xe8] sm:$0xff] %v1066_v39  ;;  %v1070_v37 = vadd.f32 %v1069_v36, %v957_v40 }
 0x161   : > { %1102 = vst [vmem:[%s2007_s10 + $0xf0] sm:$0xff] %v1068_v41 }
 0x162   : > { %1103 = vst [vmem:[%s2007_s10 + $0xf8] sm:$0xff] %v1070_v37 }
 0x163   : > { %1618 = shalt.err (!%p1615_p5)
}
 0x164   : > { %s1619_s19 = scalar_lea.hbm %s2071_s7, 4096  ;;  %s1623_s26 = scalar_lea.hbm %s2129_s3, 8192 }
 0x165   : > { %p1620_p6 = scmp.ne.s32.totalorder %s2071_s7, %s1619_s19  ;;  %p1624_p10 = scmp.lt.u32.totalorder %s2071_s7, %s2129_s3 }
 0x166   : > { %p1625_p11 = scmp.lt.u32.totalorder %s1623_s26, %s1619_s19  ;;  %p1627_p13 = scmp.lt.u32.totalorder %s1619_s19, %s2071_s7 }
 0x167   : > { %p1621_p7 = pnand %p1620_p6, %p1748_p4 }
 0x168   : > { %p1626_p12 = por %p1625_p11, %p1624_p10 }
 0x169   : > { %p1622_p9 = pneg %p1621_p7 }
 0x16a   : > { %p1628_p0 = por %p1627_p13, %p1626_p12 }
 0x16c   : > { %p1629_p1 = pnand %p1628_p0, %p1622_p9 }
 0x16e   : > { %1632 = shalt.err (!%p1629_p1)
}
 0x16f   : > { %s1686_s29 = smov 256   ;;  %s1687_s10 = smov 16  }
 0x170   : > { %1404 = dma.vmem_to_hbm [thread:$0]  (%p1748_p4), %s2073_s4, 4096, %s2071_s7, %s2080_s15, %s1686_s29, %s1686_s29, %s1687_s10  }
 0x171 PF: > { %p1410_p2 = scmp.ge.s32.totalorder %s1683_s17, 2  ;;  %s1136_s30 = sand.u32 1, %s1663_s12  }
 0x172   : > { %s1137_s5 = scalar_lea.sflag [#allocation3], %s1136_s30 }
 0x173   : > { %p1407_p3 = pnand %p1410_p2, %p1755_p8 }
 0x175   : > { %1658 = dma.done.wait (!%p1407_p3), %s1137_s5, 4096  }
 0x176   : > { %1660 = vsyncadd (!%p1407_p3), %s1137_s5, 4294963200  ;;  %s16_s17 = sadd.s32 1, %s1683_s17   ;;  %s2132_s12 = smov %s1667_s13 }
 0x177   : > { %p13_p5 = scmp.ge.s32.totalorder %s16_s17, 4   ;;  %s2133_s13 = smov %s1671_s14 }
 0x178   : > { %s2134_s14 = smov %s1761_s25  ;;  %s2135_s15 = smov %s1679_s16 }
 0x179   : > { %s2136_s16 = smov %s2138_s20  ;;  %15 = sbr.rel (!%p13_p5) target bundleno = 4 (0x4), region = 71 }
 0x180   :  { %1142 = vsyncpa [#allocation3], 1 }
 0x181   :  { %1144 = vsyncpa [#allocation3 + $0x1], 1 }

</bundles_post_ra>
